<compile_context>
chip_gen: v5e
topology: v5e:2x2
jax: 0.10.0
libtpu: 0.0.40
codegen_flags: <defaults>
</compile_context>

<pallas_src>
import math

import jax
import jax.numpy as jnp
import numpy as np
from jax import lax
from jax.experimental import pallas as pl
from jax.experimental.pallas import tpu as pltpu

_CHUNK = 8  # timesteps per unrolled inner chunk (sublane-aligned row group)


def waternet1_kernel(ps_ref, pr_ref, ev_ref, ta_ref, gates_ref, yout_ref,
                     s_ref, h_ref):
    """One (site_tile, time_block) grid step.

    ps_ref/pr_ref/ev_ref/ta_ref : (t_blk, ns_tile)   snow P, liquid P, E, relu(Ta)
    gates_ref : (4, nh, ns_tile)  rows [gm, ge, go*ga, 1-go]  (time-resident)
    yout_ref  : (t_blk, ns_tile)
    s_ref/h_ref : (nh, ns_tile) VMEM scratch carried across time blocks.
    """
    t_blk = ps_ref.shape[0]

    # First time block of a new site tile -> reset the recurrent states.
    @pl.when(pl.program_id(1) == 0)
    def _init():
        s_ref[...] = jnp.zeros_like(s_ref)
        h_ref[...] = jnp.zeros_like(h_ref)

    def chunk_body(c, carry):
        S0, H0 = carry
        base = pl.multiple_of(c * _CHUNK, _CHUNK)
        # Re-load the gates every chunk instead of holding them live across the
        # whole time loop: keeping 4 x (nh, ns_tile) values resident would spill
        # the vreg file; these reloads ride the underused vld slots.
        gm = gates_ref[0]     # exp(fc3) + 1
        ge = gates_ref[1]     # sigmoid
        goa = gates_ref[2]    # go * ga   (folded in the wrapper)
        goc = gates_ref[3]    # 1 - go    (folded in the wrapper)
        for j in range(_CHUNK):   # unrolled: full dep chain visible to the scheduler
            ps = ps_ref[pl.ds(base + j, 1), :]   # (1, ns_tile), broadcast against nh
            pr = pr_ref[pl.ds(base + j, 1), :]
            ev = ev_ref[pl.ds(base + j, 1), :]
            ta = ta_ref[pl.ds(base + j, 1), :]   # already relu'd: relu(Ta*gm)=relu(Ta)*gm
            Sm = jnp.minimum(S0, ta * gm)
            H = jnp.maximum(H0 + Sm + pr - ev * ge, 0.0)
            # y = sum_h(Q*ga) with Q = H*go  ==  sum_h(H*goa); lane-dense 1-row store.
            yout_ref[pl.ds(base + j, 1), :] = jnp.sum(H * goa, axis=0, keepdims=True)
            S0 = S0 + ps - Sm                    # == (S0 + Ps) - Sm
            H0 = H * goc                         # == H - H*go
        return S0, H0

    S0, H0 = lax.fori_loop(0, t_blk // _CHUNK, chunk_body,
                           (s_ref[...], h_ref[...]))
    s_ref[...] = S0
    h_ref[...] = H0


def _forcing(x):
    """Per-step forcing planes [Ps, Pl, E, relu(Ta)], each (nt, ns) float32."""
    P, E, T1, T2 = x[:, :, 0], x[:, :, 1], x[:, :, 2], x[:, :, 3]
    Ta = (T1 + T2) / 2
    # TODO(synk): jnp.arccos has no Mosaic/Pallas TPU lowering; this tiny (nt, ns)
    # elementwise prep stays in XLA.  NaNs from out-of-domain arccos only occur on
    # elements the two jnp.where masks overwrite (same behavior as the PyTorch code).
    rP = 1 - jnp.arccos((T1 + T2) / (T2 - T1)) / 3.1415
    rP = jnp.where(T1 >= 0, 1.0, rP)      # rP[T1 >= 0] = 1
    rP = jnp.where(T2 <= 0, 0.0, rP)      # rP[T2 <= 0] = 0  (applied last, as in torch)
    Ps = (1 - rP) * P
    Pl = rP * P
    Tap = jnp.maximum(Ta, 0.0)            # relu folded here (gm = exp(.)+1 > 0)
    return Ps, Pl, E, Tap


def _gates(xc, w3, b3, nh):
    """fc3 + nonlinearities + gate folding, hoisted out of the kernel: (4, nh, ns)."""
    w = jnp.dot(xc, w3.T, precision=lax.Precision.HIGHEST) + b3      # (ns, 4*nh)
    gm = jnp.exp(w[:, :nh]) + 1.0
    ge = jax.nn.sigmoid(w[:, nh:2 * nh])
    go = jax.nn.sigmoid(w[:, 2 * nh:3 * nh])
    ga = jax.nn.softmax(w[:, 3 * nh:], axis=1)        # nn.Dropout = identity (eval)
    goa = go * ga                                     # folded: Q*ga      = H*goa
    goc = 1.0 - go                                    # folded: H - Q     = H*goc
    return jnp.stack([gm.T, ge.T, goa.T, goc.T], axis=0).astype(jnp.float32)


def _round_up(a, m):
    return -(-a // m) * m


def _choose_site_tile(ns128, cap):
    """ns128 = ns rounded up to 128.  Returns a lane-tile width (multiple of 128)."""
    cap = max(128, cap - cap % 128)
    if ns128 <= cap:
        # Split into >=2 tiles when possible so the "parallel" site axis can be
        # sharded across v7x's two TensorCores (no effect on single-TC v5e/v6e).
        return _round_up(ns128 // 2, 128) if ns128 >= 256 else ns128
    for cand in range(cap, 127, -128):    # largest multiple of 128 dividing ns128
        if ns128 % cand == 0:
            return cand
    return cap


def waternet1_forward(x, xc, w3, b3, nh, *, time_block=512, site_tile_cap=256):
    """x: (nt, ns, 4) forcing [P, E, T1, T2]; xc: (ns, ng).  Returns (nt, ns) f32."""
    x = jnp.asarray(x, jnp.float32)
    xc = jnp.asarray(xc, jnp.float32)
    w3 = jnp.asarray(w3, jnp.float32)
    b3 = jnp.asarray(b3, jnp.float32)
    nt, ns, _ = x.shape

    Ps, Pl, E, Tap = _forcing(x)                     # (nt, ns) each
    gates = _gates(xc, w3, b3, nh)                   # (4, nh, ns)

    # --- time blocking (t_blk always a multiple of 8) ---
    t_blk = min(_round_up(time_block, _CHUNK), _round_up(nt, _CHUNK))
    assert t_blk % _CHUNK == 0
    nt_pad = _round_up(nt, t_blk)

    # --- site (lane) tiling: pad ns to a multiple of 128 so every op/store is
    # lane-dense, then split into tiles ---
    ns128 = _round_up(ns, 128)
    ns_tile = _choose_site_tile(ns128, site_tile_cap)
    ns_pad = _round_up(ns128, ns_tile)

    # Zero padding is safe: padded site columns have zero gates/forcing (outputs 0);
    # padded timesteps sit at the TAIL of the last time block of each site tile,
    # after all real steps, and their outputs are sliced off below.  Do not change
    # the grid order (time must remain the innermost, sequential axis).
    pad2 = lambda a: jnp.pad(a, ((0, nt_pad - nt), (0, ns_pad - ns)))
    Ps, Pl, E, Tap = pad2(Ps), pad2(Pl), pad2(E), pad2(Tap)
    gates = jnp.pad(gates, ((0, 0), (0, 0), (0, ns_pad - ns)))

    n_site = ns_pad // ns_tile
    n_tb = nt_pad // t_blk

    forc_spec = pl.BlockSpec((t_blk, ns_tile), lambda si, tb: (tb, si))
    grid_spec = pltpu.PrefetchScalarGridSpec(
        num_scalar_prefetch=0,
        grid=(n_site, n_tb),                         # time innermost -> sequential
        in_specs=[forc_spec, forc_spec, forc_spec, forc_spec,
                  pl.BlockSpec((4, nh, ns_tile), lambda si, tb: (0, 0, si))],
        out_specs=pl.BlockSpec((t_blk, ns_tile), lambda si, tb: (tb, si)),
        scratch_shapes=[pltpu.VMEM((nh, ns_tile), jnp.float32),   # S0
                        pltpu.VMEM((nh, ns_tile), jnp.float32)],  # H0
    )

    yout = pl.pallas_call(
        waternet1_kernel,
        out_shape=jax.ShapeDtypeStruct((nt_pad, ns_pad), jnp.float32),
        grid_spec=grid_spec,
        compiler_params=pltpu.CompilerParams(
            dimension_semantics=("parallel", "arbitrary")),
    )(Ps, Pl, E, Tap, gates)

    return yout[:nt, :ns]


def waternet1_reference(x, xc, w3, b3, nh):
    """Pure-JAX transcription of the PyTorch forward (correctness oracle)."""
    x = jnp.asarray(x, jnp.float32)
    xc = jnp.asarray(xc, jnp.float32)
    w3 = jnp.asarray(w3, jnp.float32)
    b3 = jnp.asarray(b3, jnp.float32)
    P, E, T1, T2 = x[:, :, 0], x[:, :, 1], x[:, :, 2], x[:, :, 3]
    Ta = (T1 + T2) / 2
    rP = 1 - jnp.arccos((T1 + T2) / (T2 - T1)) / 3.1415
    rP = jnp.where(T1 >= 0, 1.0, rP)
    rP = jnp.where(T2 <= 0, 0.0, rP)
    Ps = (1 - rP) * P
    Pl = rP * P
    w = jnp.dot(xc, w3.T, precision=lax.Precision.HIGHEST) + b3
    gm = jnp.exp(w[:, :nh]) + 1.0
    ge = jax.nn.sigmoid(w[:, nh:2 * nh])
    go = jax.nn.sigmoid(w[:, 2 * nh:3 * nh])
    ga = jax.nn.softmax(w[:, 3 * nh:], axis=1)        # Dropout = identity (eval mode)
    ns = x.shape[1]
    S0 = jnp.zeros((ns, nh), jnp.float32)
    H0 = jnp.zeros((ns, nh), jnp.float32)
    ys = []
    for k in range(x.shape[0]):
        Sm = jnp.minimum(S0, jnp.maximum(Ta[k, :, None] * gm, 0.0))
        S = S0 + Ps[k, :, None]
        H = jnp.maximum(H0 + Sm + Pl[k, :, None] - E[k, :, None] * ge, 0.0)
        Q = H * go
        H0 = H - Q
        S0 = S - Sm
        ys.append(jnp.sum(Q * ga, axis=1))
    return jnp.stack(ys, axis=0)


if __name__ == "__main__":
    def _run_case(nh, ng, nt, ns, case, **fwd_kwargs):
        key = jax.random.fold_in(jax.random.PRNGKey(0), case)
        k1, k2, k3, k4 = jax.random.split(key, 4)
        x = jax.random.normal(k1, (nt, ns, 4), dtype=jnp.float32)     # [P, E, T1, T2]
        xc = jax.random.normal(k2, (ns, ng), dtype=jnp.float32)       # static attributes
        # Deterministic init matching reset_parameters(): uniform(-1/sqrt(nh), 1/sqrt(nh)).
        std = 1.0 / math.sqrt(nh)
        w3 = jax.random.uniform(k3, (nh * 4, ng), minval=-std, maxval=std, dtype=jnp.float32)
        b3 = jax.random.uniform(k4, (nh * 4,), minval=-std, maxval=std, dtype=jnp.float32)

        y = jax.block_until_ready(waternet1_forward(x, xc, w3, b3, nh, **fwd_kwargs))
        y_ref = jax.block_until_ready(waternet1_reference(x, xc, w3, b3, nh))
        np.testing.assert_allclose(np.asarray(y), np.asarray(y_ref), rtol=2e-4, atol=2e-5)

    # Small canonical case (nh=32, ng=8, nt=8, ns=16): one time block, one site tile.
    _run_case(nh=32, ng=8, nt=8, ns=16, case=0)

    # Exercise the blocked paths: 3 time blocks (with time padding) x 2 site tiles.
    _run_case(nh=32, ng=8, nt=40, ns=256, case=1, time_block=16)

    print("KERNEL_OK")
</pallas_src>

<mosaic_0001>
module attributes {stable_mosaic.version = 11 : i64} {
  func.func @waternet1_kernel(%arg0: i32, %arg1: i32, %arg2: memref<8x128xf32, #tpu.memory_space<vmem>>, %arg3: memref<8x128xf32, #tpu.memory_space<vmem>>, %arg4: memref<8x128xf32, #tpu.memory_space<vmem>>, %arg5: memref<8x128xf32, #tpu.memory_space<vmem>>, %arg6: memref<4x32x128xf32, #tpu.memory_space<vmem>>, %arg7: memref<8x128xf32, #tpu.memory_space<vmem>>, %arg8: memref<32x128xf32, #tpu.memory_space<vmem>>, %arg9: memref<32x128xf32, #tpu.memory_space<vmem>>) attributes {dimension_semantics = [#tpu.dimension_semantics<parallel>, #tpu.dimension_semantics<arbitrary>], iteration_bounds = array<i64: 1, 1>, scalar_prefetch = 0 : i64, scratch_operands = 2 : i64, tpu.core_type = #tpu.core_type<tc>, window_params = [{transform_indices = @transform_0, window_bounds = array<i64: 8, 128>}, {transform_indices = @transform_1, window_bounds = array<i64: 8, 128>}, {transform_indices = @transform_2, window_bounds = array<i64: 8, 128>}, {transform_indices = @transform_3, window_bounds = array<i64: 8, 128>}, {transform_indices = @transform_4, window_bounds = array<i64: 4, 32, 128>}, {transform_indices = @transform_5, window_bounds = array<i64: 8, 128>}]} {
    %c0_i32 = arith.constant 0 : i32
    %0 = arith.cmpi eq, %arg1, %c0_i32 : i32
    %1 = arith.extui %0 : i1 to i32
    %c0_i32_0 = arith.constant 0 : i32
    %2 = arith.cmpi ne, %1, %c0_i32_0 : i32
    scf.if %2 {
      %cst_107 = arith.constant 0.000000e+00 : f32
      %281 = vector.broadcast %cst_107 : f32 to vector<32x128xf32>
      %c0_108 = arith.constant 0 : index
      %c0_109 = arith.constant 0 : index
      %282 = vector.load %arg8[%c0_108, %c0_109] : memref<32x128xf32, #tpu.memory_space<vmem>>, vector<32x128xf32>
      tpu.vector_store %arg8[%c0_108, %c0_109], %281 {strides = array<i32>} : memref<32x128xf32, #tpu.memory_space<vmem>>, vector<32x128xf32>,
      %cst_110 = arith.constant 0.000000e+00 : f32
      %283 = vector.broadcast %cst_110 : f32 to vector<32x128xf32>
      %c0_111 = arith.constant 0 : index
      %c0_112 = arith.constant 0 : index
      %284 = vector.load %arg9[%c0_111, %c0_112] : memref<32x128xf32, #tpu.memory_space<vmem>>, vector<32x128xf32>
      tpu.vector_store %arg9[%c0_111, %c0_112], %283 {strides = array<i32>} : memref<32x128xf32, #tpu.memory_space<vmem>>, vector<32x128xf32>,
    } else {
    }
    %c0 = arith.constant 0 : index
    %c0_1 = arith.constant 0 : index
    %3 = vector.load %arg8[%c0, %c0_1] : memref<32x128xf32, #tpu.memory_space<vmem>>, vector<32x128xf32>
    %c0_2 = arith.constant 0 : index
    %c0_3 = arith.constant 0 : index
    %4 = vector.load %arg9[%c0_2, %c0_3] : memref<32x128xf32, #tpu.memory_space<vmem>>, vector<32x128xf32>
    %c0_i32_4 = arith.constant 0 : i32
    %c8_i32 = arith.constant 8 : i32
    %5 = arith.muli %c0_i32_4, %c8_i32 : i32
    %6 = tpu.assume_multiple %5, 8 : i32
    %c0_5 = arith.constant 0 : index
    %c0_6 = arith.constant 0 : index
    %c0_7 = arith.constant 0 : index
    %7 = vector.load %arg6[%c0_5, %c0_6, %c0_7] : memref<4x32x128xf32, #tpu.memory_space<vmem>>, vector<1x32x128xf32>
    %8 = vector.shape_cast %7 : vector<1x32x128xf32> to vector<32x128xf32>
    %c1 = arith.constant 1 : index
    %c0_8 = arith.constant 0 : index
    %c0_9 = arith.constant 0 : index
    %9 = vector.load %arg6[%c1, %c0_8, %c0_9] : memref<4x32x128xf32, #tpu.memory_space<vmem>>, vector<1x32x128xf32>
    %10 = vector.shape_cast %9 : vector<1x32x128xf32> to vector<32x128xf32>
    %c2 = arith.constant 2 : index
    %c0_10 = arith.constant 0 : index
    %c0_11 = arith.constant 0 : index
    %11 = vector.load %arg6[%c2, %c0_10, %c0_11] : memref<4x32x128xf32, #tpu.memory_space<vmem>>, vector<1x32x128xf32>
    %12 = vector.shape_cast %11 : vector<1x32x128xf32> to vector<32x128xf32>
    %c3 = arith.constant 3 : index
    %c0_12 = arith.constant 0 : index
    %c0_13 = arith.constant 0 : index
    %13 = vector.load %arg6[%c3, %c0_12, %c0_13] : memref<4x32x128xf32, #tpu.memory_space<vmem>>, vector<1x32x128xf32>
    %14 = vector.shape_cast %13 : vector<1x32x128xf32> to vector<32x128xf32>
    %c0_i32_14 = arith.constant 0 : i32
    %15 = arith.addi %6, %c0_i32_14 : i32
    %16 = arith.index_cast %15 : i32 to index
    %c0_15 = arith.constant 0 : index
    %17 = vector.load %arg2[%16, %c0_15] : memref<8x128xf32, #tpu.memory_space<vmem>>, vector<1x128xf32>
    %c0_i32_16 = arith.constant 0 : i32
    %18 = arith.addi %6, %c0_i32_16 : i32
    %19 = arith.index_cast %18 : i32 to index
    %c0_17 = arith.constant 0 : index
    %20 = vector.load %arg3[%19, %c0_17] : memref<8x128xf32, #tpu.memory_space<vmem>>, vector<1x128xf32>
    %c0_i32_18 = arith.constant 0 : i32
    %21 = arith.addi %6, %c0_i32_18 : i32
    %22 = arith.index_cast %21 : i32 to index
    %c0_19 = arith.constant 0 : index
    %23 = vector.load %arg4[%22, %c0_19] : memref<8x128xf32, #tpu.memory_space<vmem>>, vector<1x128xf32>
    %c0_i32_20 = arith.constant 0 : i32
    %24 = arith.addi %6, %c0_i32_20 : i32
    %25 = arith.index_cast %24 : i32 to index
    %c0_21 = arith.constant 0 : index
    %26 = vector.load %arg5[%25, %c0_21] : memref<8x128xf32, #tpu.memory_space<vmem>>, vector<1x128xf32>
    %27 = vector.broadcast %26 : vector<1x128xf32> to vector<32x128xf32>
    %28 = arith.mulf %27, %8 : vector<32x128xf32>
    %29 = arith.minimumf %3, %28 : vector<32x128xf32>
    %30 = arith.addf %4, %29 : vector<32x128xf32>
    %31 = vector.broadcast %20 : vector<1x128xf32> to vector<32x128xf32>
    %32 = arith.addf %30, %31 : vector<32x128xf32>
    %33 = vector.broadcast %23 : vector<1x128xf32> to vector<32x128xf32>
    %34 = arith.mulf %33, %10 : vector<32x128xf32>
    %35 = arith.subf %32, %34 : vector<32x128xf32>
    %cst = arith.constant 0.000000e+00 : f32
    %36 = vector.broadcast %cst : f32 to vector<32x128xf32>
    %37 = arith.maximumf %35, %36 : vector<32x128xf32>
    %38 = arith.mulf %37, %12 : vector<32x128xf32>
    %cst_22 = arith.constant dense<0.000000e+00> : vector<128xf32>
    %39 = vector.multi_reduction <add>, %38, %cst_22 [0] : vector<32x128xf32> to vector<128xf32>
    %40 = vector.shape_cast %39 : vector<128xf32> to vector<1x128xf32>
    %c0_i32_23 = arith.constant 0 : i32
    %41 = arith.addi %6, %c0_i32_23 : i32
    %42 = arith.index_cast %41 : i32 to index
    %c0_24 = arith.constant 0 : index
    %43 = vector.load %arg7[%42, %c0_24] : memref<8x128xf32, #tpu.memory_space<vmem>>, vector<1x128xf32>
    tpu.vector_store %arg7[%42, %c0_24], %40 {strides = array<i32>} : memref<8x128xf32, #tpu.memory_space<vmem>>, vector<1x128xf32>,
    %44 = vector.broadcast %17 : vector<1x128xf32> to vector<32x128xf32>
    %45 = arith.addf %3, %44 : vector<32x128xf32>
    %46 = arith.subf %45, %29 : vector<32x128xf32>
    %47 = arith.mulf %37, %14 : vector<32x128xf32>
    %c1_i32 = arith.constant 1 : i32
    %48 = arith.addi %6, %c1_i32 : i32
    %49 = arith.index_cast %48 : i32 to index
    %c0_25 = arith.constant 0 : index
    %50 = vector.load %arg2[%49, %c0_25] : memref<8x128xf32, #tpu.memory_space<vmem>>, vector<1x128xf32>
    %c1_i32_26 = arith.constant 1 : i32
    %51 = arith.addi %6, %c1_i32_26 : i32
    %52 = arith.index_cast %51 : i32 to index
    %c0_27 = arith.constant 0 : index
    %53 = vector.load %arg3[%52, %c0_27] : memref<8x128xf32, #tpu.memory_space<vmem>>, vector<1x128xf32>
    %c1_i32_28 = arith.constant 1 : i32
    %54 = arith.addi %6, %c1_i32_28 : i32
    %55 = arith.index_cast %54 : i32 to index
    %c0_29 = arith.constant 0 : index
    %56 = vector.load %arg4[%55, %c0_29] : memref<8x128xf32, #tpu.memory_space<vmem>>, vector<1x128xf32>
    %c1_i32_30 = arith.constant 1 : i32
    %57 = arith.addi %6, %c1_i32_30 : i32
    %58 = arith.index_cast %57 : i32 to index
    %c0_31 = arith.constant 0 : index
    %59 = vector.load %arg5[%58, %c0_31] : memref<8x128xf32, #tpu.memory_space<vmem>>, vector<1x128xf32>
    %60 = vector.broadcast %59 : vector<1x128xf32> to vector<32x128xf32>
    %61 = arith.mulf %60, %8 : vector<32x128xf32>
    %62 = arith.minimumf %46, %61 : vector<32x128xf32>
    %63 = arith.addf %47, %62 : vector<32x128xf32>
    %64 = vector.broadcast %53 : vector<1x128xf32> to vector<32x128xf32>
    %65 = arith.addf %63, %64 : vector<32x128xf32>
    %66 = vector.broadcast %56 : vector<1x128xf32> to vector<32x128xf32>
    %67 = arith.mulf %66, %10 : vector<32x128xf32>
    %68 = arith.subf %65, %67 : vector<32x128xf32>
    %cst_32 = arith.constant 0.000000e+00 : f32
    %69 = vector.broadcast %cst_32 : f32 to vector<32x128xf32>
    %70 = arith.maximumf %68, %69 : vector<32x128xf32>
    %71 = arith.mulf %70, %12 : vector<32x128xf32>
    %cst_33 = arith.constant dense<0.000000e+00> : vector<128xf32>
    %72 = vector.multi_reduction <add>, %71, %cst_33 [0] : vector<32x128xf32> to vector<128xf32>
    %73 = vector.shape_cast %72 : vector<128xf32> to vector<1x128xf32>
    %c1_i32_34 = arith.constant 1 : i32
    %74 = arith.addi %6, %c1_i32_34 : i32
    %75 = arith.index_cast %74 : i32 to index
    %c0_35 = arith.constant 0 : index
    %76 = vector.load %arg7[%75, %c0_35] : memref<8x128xf32, #tpu.memory_space<vmem>>, vector<1x128xf32>
    tpu.vector_store %arg7[%75, %c0_35], %73 {strides = array<i32>} : memref<8x128xf32, #tpu.memory_space<vmem>>, vector<1x128xf32>,
    %77 = vector.broadcast %50 : vector<1x128xf32> to vector<32x128xf32>
    %78 = arith.addf %46, %77 : vector<32x128xf32>
    %79 = arith.subf %78, %62 : vector<32x128xf32>
    %80 = arith.mulf %70, %14 : vector<32x128xf32>
    %c2_i32 = arith.constant 2 : i32
    %81 = arith.addi %6, %c2_i32 : i32
    %82 = arith.index_cast %81 : i32 to index
    %c0_36 = arith.constant 0 : index
    %83 = vector.load %arg2[%82, %c0_36] : memref<8x128xf32, #tpu.memory_space<vmem>>, vector<1x128xf32>
    %c2_i32_37 = arith.constant 2 : i32
    %84 = arith.addi %6, %c2_i32_37 : i32
    %85 = arith.index_cast %84 : i32 to index
    %c0_38 = arith.constant 0 : index
    %86 = vector.load %arg3[%85, %c0_38] : memref<8x128xf32, #tpu.memory_space<vmem>>, vector<1x128xf32>
    %c2_i32_39 = arith.constant 2 : i32
    %87 = arith.addi %6, %c2_i32_39 : i32
    %88 = arith.index_cast %87 : i32 to index
    %c0_40 = arith.constant 0 : index
    %89 = vector.load %arg4[%88, %c0_40] : memref<8x128xf32, #tpu.memory_space<vmem>>, vector<1x128xf32>
    %c2_i32_41 = arith.constant 2 : i32
    %90 = arith.addi %6, %c2_i32_41 : i32
    %91 = arith.index_cast %90 : i32 to index
    %c0_42 = arith.constant 0 : index
    %92 = vector.load %arg5[%91, %c0_42] : memref<8x128xf32, #tpu.memory_space<vmem>>, vector<1x128xf32>
    %93 = vector.broadcast %92 : vector<1x128xf32> to vector<32x128xf32>
    %94 = arith.mulf %93, %8 : vector<32x128xf32>
    %95 = arith.minimumf %79, %94 : vector<32x128xf32>
    %96 = arith.addf %80, %95 : vector<32x128xf32>
    %97 = vector.broadcast %86 : vector<1x128xf32> to vector<32x128xf32>
    %98 = arith.addf %96, %97 : vector<32x128xf32>
    %99 = vector.broadcast %89 : vector<1x128xf32> to vector<32x128xf32>
    %100 = arith.mulf %99, %10 : vector<32x128xf32>
    %101 = arith.subf %98, %100 : vector<32x128xf32>
    %cst_43 = arith.constant 0.000000e+00 : f32
    %102 = vector.broadcast %cst_43 : f32 to vector<32x128xf32>
    %103 = arith.maximumf %101, %102 : vector<32x128xf32>
    %104 = arith.mulf %103, %12 : vector<32x128xf32>
    %cst_44 = arith.constant dense<0.000000e+00> : vector<128xf32>
    %105 = vector.multi_reduction <add>, %104, %cst_44 [0] : vector<32x128xf32> to vector<128xf32>
    %106 = vector.shape_cast %105 : vector<128xf32> to vector<1x128xf32>
    %c2_i32_45 = arith.constant 2 : i32
    %107 = arith.addi %6, %c2_i32_45 : i32
    %108 = arith.index_cast %107 : i32 to index
    %c0_46 = arith.constant 0 : index
    %109 = vector.load %arg7[%108, %c0_46] : memref<8x128xf32, #tpu.memory_space<vmem>>, vector<1x128xf32>
    tpu.vector_store %arg7[%108, %c0_46], %106 {strides = array<i32>} : memref<8x128xf32, #tpu.memory_space<vmem>>, vector<1x128xf32>,
    %110 = vector.broadcast %83 : vector<1x128xf32> to vector<32x128xf32>
    %111 = arith.addf %79, %110 : vector<32x128xf32>
    %112 = arith.subf %111, %95 : vector<32x128xf32>
    %113 = arith.mulf %103, %14 : vector<32x128xf32>
    %c3_i32 = arith.constant 3 : i32
    %114 = arith.addi %6, %c3_i32 : i32
    %115 = arith.index_cast %114 : i32 to index
    %c0_47 = arith.constant 0 : index
    %116 = vector.load %arg2[%115, %c0_47] : memref<8x128xf32, #tpu.memory_space<vmem>>, vector<1x128xf32>
    %c3_i32_48 = arith.constant 3 : i32
    %117 = arith.addi %6, %c3_i32_48 : i32
    %118 = arith.index_cast %117 : i32 to index
    %c0_49 = arith.constant 0 : index
    %119 = vector.load %arg3[%118, %c0_49] : memref<8x128xf32, #tpu.memory_space<vmem>>, vector<1x128xf32>
    %c3_i32_50 = arith.constant 3 : i32
    %120 = arith.addi %6, %c3_i32_50 : i32
    %121 = arith.index_cast %120 : i32 to index
    %c0_51 = arith.constant 0 : index
    %122 = vector.load %arg4[%121, %c0_51] : memref<8x128xf32, #tpu.memory_space<vmem>>, vector<1x128xf32>
    %c3_i32_52 = arith.constant 3 : i32
    %123 = arith.addi %6, %c3_i32_52 : i32
    %124 = arith.index_cast %123 : i32 to index
    %c0_53 = arith.constant 0 : index
    %125 = vector.load %arg5[%124, %c0_53] : memref<8x128xf32, #tpu.memory_space<vmem>>, vector<1x128xf32>
    %126 = vector.broadcast %125 : vector<1x128xf32> to vector<32x128xf32>
    %127 = arith.mulf %126, %8 : vector<32x128xf32>
    %128 = arith.minimumf %112, %127 : vector<32x128xf32>
    %129 = arith.addf %113, %128 : vector<32x128xf32>
    %130 = vector.broadcast %119 : vector<1x128xf32> to vector<32x128xf32>
    %131 = arith.addf %129, %130 : vector<32x128xf32>
    %132 = vector.broadcast %122 : vector<1x128xf32> to vector<32x128xf32>
    %133 = arith.mulf %132, %10 : vector<32x128xf32>
    %134 = arith.subf %131, %133 : vector<32x128xf32>
    %cst_54 = arith.constant 0.000000e+00 : f32
    %135 = vector.broadcast %cst_54 : f32 to vector<32x128xf32>
    %136 = arith.maximumf %134, %135 : vector<32x128xf32>
    %137 = arith.mulf %136, %12 : vector<32x128xf32>
    %cst_55 = arith.constant dense<0.000000e+00> : vector<128xf32>
    %138 = vector.multi_reduction <add>, %137, %cst_55 [0] : vector<32x128xf32> to vector<128xf32>
    %139 = vector.shape_cast %138 : vector<128xf32> to vector<1x128xf32>
    %c3_i32_56 = arith.constant 3 : i32
    %140 = arith.addi %6, %c3_i32_56 : i32
    %141 = arith.index_cast %140 : i32 to index
    %c0_57 = arith.constant 0 : index
    %142 = vector.load %arg7[%141, %c0_57] : memref<8x128xf32, #tpu.memory_space<vmem>>, vector<1x128xf32>
    tpu.vector_store %arg7[%141, %c0_57], %139 {strides = array<i32>} : memref<8x128xf32, #tpu.memory_space<vmem>>, vector<1x128xf32>,
    %143 = vector.broadcast %116 : vector<1x128xf32> to vector<32x128xf32>
    %144 = arith.addf %112, %143 : vector<32x128xf32>
    %145 = arith.subf %144, %128 : vector<32x128xf32>
    %146 = arith.mulf %136, %14 : vector<32x128xf32>
    %c4_i32 = arith.constant 4 : i32
    %147 = arith.addi %6, %c4_i32 : i32
    %148 = arith.index_cast %147 : i32 to index
    %c0_58 = arith.constant 0 : index
    %149 = vector.load %arg2[%148, %c0_58] : memref<8x128xf32, #tpu.memory_space<vmem>>, vector<1x128xf32>
    %c4_i32_59 = arith.constant 4 : i32
    %150 = arith.addi %6, %c4_i32_59 : i32
    %151 = arith.index_cast %150 : i32 to index
    %c0_60 = arith.constant 0 : index
    %152 = vector.load %arg3[%151, %c0_60] : memref<8x128xf32, #tpu.memory_space<vmem>>, vector<1x128xf32>
    %c4_i32_61 = arith.constant 4 : i32
    %153 = arith.addi %6, %c4_i32_61 : i32
    %154 = arith.index_cast %153 : i32 to index
    %c0_62 = arith.constant 0 : index
    %155 = vector.load %arg4[%154, %c0_62] : memref<8x128xf32, #tpu.memory_space<vmem>>, vector<1x128xf32>
    %c4_i32_63 = arith.constant 4 : i32
    %156 = arith.addi %6, %c4_i32_63 : i32
    %157 = arith.index_cast %156 : i32 to index
    %c0_64 = arith.constant 0 : index
    %158 = vector.load %arg5[%157, %c0_64] : memref<8x128xf32, #tpu.memory_space<vmem>>, vector<1x128xf32>
    %159 = vector.broadcast %158 : vector<1x128xf32> to vector<32x128xf32>
    %160 = arith.mulf %159, %8 : vector<32x128xf32>
    %161 = arith.minimumf %145, %160 : vector<32x128xf32>
    %162 = arith.addf %146, %161 : vector<32x128xf32>
    %163 = vector.broadcast %152 : vector<1x128xf32> to vector<32x128xf32>
    %164 = arith.addf %162, %163 : vector<32x128xf32>
    %165 = vector.broadcast %155 : vector<1x128xf32> to vector<32x128xf32>
    %166 = arith.mulf %165, %10 : vector<32x128xf32>
    %167 = arith.subf %164, %166 : vector<32x128xf32>
    %cst_65 = arith.constant 0.000000e+00 : f32
    %168 = vector.broadcast %cst_65 : f32 to vector<32x128xf32>
    %169 = arith.maximumf %167, %168 : vector<32x128xf32>
    %170 = arith.mulf %169, %12 : vector<32x128xf32>
    %cst_66 = arith.constant dense<0.000000e+00> : vector<128xf32>
    %171 = vector.multi_reduction <add>, %170, %cst_66 [0] : vector<32x128xf32> to vector<128xf32>
    %172 = vector.shape_cast %171 : vector<128xf32> to vector<1x128xf32>
    %c4_i32_67 = arith.constant 4 : i32
    %173 = arith.addi %6, %c4_i32_67 : i32
    %174 = arith.index_cast %173 : i32 to index
    %c0_68 = arith.constant 0 : index
    %175 = vector.load %arg7[%174, %c0_68] : memref<8x128xf32, #tpu.memory_space<vmem>>, vector<1x128xf32>
    tpu.vector_store %arg7[%174, %c0_68], %172 {strides = array<i32>} : memref<8x128xf32, #tpu.memory_space<vmem>>, vector<1x128xf32>,
    %176 = vector.broadcast %149 : vector<1x128xf32> to vector<32x128xf32>
    %177 = arith.addf %145, %176 : vector<32x128xf32>
    %178 = arith.subf %177, %161 : vector<32x128xf32>
    %179 = arith.mulf %169, %14 : vector<32x128xf32>
    %c5_i32 = arith.constant 5 : i32
    %180 = arith.addi %6, %c5_i32 : i32
    %181 = arith.index_cast %180 : i32 to index
    %c0_69 = arith.constant 0 : index
    %182 = vector.load %arg2[%181, %c0_69] : memref<8x128xf32, #tpu.memory_space<vmem>>, vector<1x128xf32>
    %c5_i32_70 = arith.constant 5 : i32
    %183 = arith.addi %6, %c5_i32_70 : i32
    %184 = arith.index_cast %183 : i32 to index
    %c0_71 = arith.constant 0 : index
    %185 = vector.load %arg3[%184, %c0_71] : memref<8x128xf32, #tpu.memory_space<vmem>>, vector<1x128xf32>
    %c5_i32_72 = arith.constant 5 : i32
    %186 = arith.addi %6, %c5_i32_72 : i32
    %187 = arith.index_cast %186 : i32 to index
    %c0_73 = arith.constant 0 : index
    %188 = vector.load %arg4[%187, %c0_73] : memref<8x128xf32, #tpu.memory_space<vmem>>, vector<1x128xf32>
    %c5_i32_74 = arith.constant 5 : i32
    %189 = arith.addi %6, %c5_i32_74 : i32
    %190 = arith.index_cast %189 : i32 to index
    %c0_75 = arith.constant 0 : index
    %191 = vector.load %arg5[%190, %c0_75] : memref<8x128xf32, #tpu.memory_space<vmem>>, vector<1x128xf32>
    %192 = vector.broadcast %191 : vector<1x128xf32> to vector<32x128xf32>
    %193 = arith.mulf %192, %8 : vector<32x128xf32>
    %194 = arith.minimumf %178, %193 : vector<32x128xf32>
    %195 = arith.addf %179, %194 : vector<32x128xf32>
    %196 = vector.broadcast %185 : vector<1x128xf32> to vector<32x128xf32>
    %197 = arith.addf %195, %196 : vector<32x128xf32>
    %198 = vector.broadcast %188 : vector<1x128xf32> to vector<32x128xf32>
    %199 = arith.mulf %198, %10 : vector<32x128xf32>
    %200 = arith.subf %197, %199 : vector<32x128xf32>
    %cst_76 = arith.constant 0.000000e+00 : f32
    %201 = vector.broadcast %cst_76 : f32 to vector<32x128xf32>
    %202 = arith.maximumf %200, %201 : vector<32x128xf32>
    %203 = arith.mulf %202, %12 : vector<32x128xf32>
    %cst_77 = arith.constant dense<0.000000e+00> : vector<128xf32>
    %204 = vector.multi_reduction <add>, %203, %cst_77 [0] : vector<32x128xf32> to vector<128xf32>
    %205 = vector.shape_cast %204 : vector<128xf32> to vector<1x128xf32>
    %c5_i32_78 = arith.constant 5 : i32
    %206 = arith.addi %6, %c5_i32_78 : i32
    %207 = arith.index_cast %206 : i32 to index
    %c0_79 = arith.constant 0 : index
    %208 = vector.load %arg7[%207, %c0_79] : memref<8x128xf32, #tpu.memory_space<vmem>>, vector<1x128xf32>
    tpu.vector_store %arg7[%207, %c0_79], %205 {strides = array<i32>} : memref<8x128xf32, #tpu.memory_space<vmem>>, vector<1x128xf32>,
    %209 = vector.broadcast %182 : vector<1x128xf32> to vector<32x128xf32>
    %210 = arith.addf %178, %209 : vector<32x128xf32>
    %211 = arith.subf %210, %194 : vector<32x128xf32>
    %212 = arith.mulf %202, %14 : vector<32x128xf32>
    %c6_i32 = arith.constant 6 : i32
    %213 = arith.addi %6, %c6_i32 : i32
    %214 = arith.index_cast %213 : i32 to index
    %c0_80 = arith.constant 0 : index
    %215 = vector.load %arg2[%214, %c0_80] : memref<8x128xf32, #tpu.memory_space<vmem>>, vector<1x128xf32>
    %c6_i32_81 = arith.constant 6 : i32
    %216 = arith.addi %6, %c6_i32_81 : i32
    %217 = arith.index_cast %216 : i32 to index
    %c0_82 = arith.constant 0 : index
    %218 = vector.load %arg3[%217, %c0_82] : memref<8x128xf32, #tpu.memory_space<vmem>>, vector<1x128xf32>
    %c6_i32_83 = arith.constant 6 : i32
    %219 = arith.addi %6, %c6_i32_83 : i32
    %220 = arith.index_cast %219 : i32 to index
    %c0_84 = arith.constant 0 : index
    %221 = vector.load %arg4[%220, %c0_84] : memref<8x128xf32, #tpu.memory_space<vmem>>, vector<1x128xf32>
    %c6_i32_85 = arith.constant 6 : i32
    %222 = arith.addi %6, %c6_i32_85 : i32
    %223 = arith.index_cast %222 : i32 to index
    %c0_86 = arith.constant 0 : index
    %224 = vector.load %arg5[%223, %c0_86] : memref<8x128xf32, #tpu.memory_space<vmem>>, vector<1x128xf32>
    %225 = vector.broadcast %224 : vector<1x128xf32> to vector<32x128xf32>
    %226 = arith.mulf %225, %8 : vector<32x128xf32>
    %227 = arith.minimumf %211, %226 : vector<32x128xf32>
    %228 = arith.addf %212, %227 : vector<32x128xf32>
    %229 = vector.broadcast %218 : vector<1x128xf32> to vector<32x128xf32>
    %230 = arith.addf %228, %229 : vector<32x128xf32>
    %231 = vector.broadcast %221 : vector<1x128xf32> to vector<32x128xf32>
    %232 = arith.mulf %231, %10 : vector<32x128xf32>
    %233 = arith.subf %230, %232 : vector<32x128xf32>
    %cst_87 = arith.constant 0.000000e+00 : f32
    %234 = vector.broadcast %cst_87 : f32 to vector<32x128xf32>
    %235 = arith.maximumf %233, %234 : vector<32x128xf32>
    %236 = arith.mulf %235, %12 : vector<32x128xf32>
    %cst_88 = arith.constant dense<0.000000e+00> : vector<128xf32>
    %237 = vector.multi_reduction <add>, %236, %cst_88 [0] : vector<32x128xf32> to vector<128xf32>
    %238 = vector.shape_cast %237 : vector<128xf32> to vector<1x128xf32>
    %c6_i32_89 = arith.constant 6 : i32
    %239 = arith.addi %6, %c6_i32_89 : i32
    %240 = arith.index_cast %239 : i32 to index
    %c0_90 = arith.constant 0 : index
    %241 = vector.load %arg7[%240, %c0_90] : memref<8x128xf32, #tpu.memory_space<vmem>>, vector<1x128xf32>
    tpu.vector_store %arg7[%240, %c0_90], %238 {strides = array<i32>} : memref<8x128xf32, #tpu.memory_space<vmem>>, vector<1x128xf32>,
    %242 = vector.broadcast %215 : vector<1x128xf32> to vector<32x128xf32>
    %243 = arith.addf %211, %242 : vector<32x128xf32>
    %244 = arith.subf %243, %227 : vector<32x128xf32>
    %245 = arith.mulf %235, %14 : vector<32x128xf32>
    %c7_i32 = arith.constant 7 : i32
    %246 = arith.addi %6, %c7_i32 : i32
    %247 = arith.index_cast %246 : i32 to index
    %c0_91 = arith.constant 0 : index
    %248 = vector.load %arg2[%247, %c0_91] : memref<8x128xf32, #tpu.memory_space<vmem>>, vector<1x128xf32>
    %c7_i32_92 = arith.constant 7 : i32
    %249 = arith.addi %6, %c7_i32_92 : i32
    %250 = arith.index_cast %249 : i32 to index
    %c0_93 = arith.constant 0 : index
    %251 = vector.load %arg3[%250, %c0_93] : memref<8x128xf32, #tpu.memory_space<vmem>>, vector<1x128xf32>
    %c7_i32_94 = arith.constant 7 : i32
    %252 = arith.addi %6, %c7_i32_94 : i32
    %253 = arith.index_cast %252 : i32 to index
    %c0_95 = arith.constant 0 : index
    %254 = vector.load %arg4[%253, %c0_95] : memref<8x128xf32, #tpu.memory_space<vmem>>, vector<1x128xf32>
    %c7_i32_96 = arith.constant 7 : i32
    %255 = arith.addi %6, %c7_i32_96 : i32
    %256 = arith.index_cast %255 : i32 to index
    %c0_97 = arith.constant 0 : index
    %257 = vector.load %arg5[%256, %c0_97] : memref<8x128xf32, #tpu.memory_space<vmem>>, vector<1x128xf32>
    %258 = vector.broadcast %257 : vector<1x128xf32> to vector<32x128xf32>
    %259 = arith.mulf %258, %8 : vector<32x128xf32>
    %260 = arith.minimumf %244, %259 : vector<32x128xf32>
    %261 = arith.addf %245, %260 : vector<32x128xf32>
    %262 = vector.broadcast %251 : vector<1x128xf32> to vector<32x128xf32>
    %263 = arith.addf %261, %262 : vector<32x128xf32>
    %264 = vector.broadcast %254 : vector<1x128xf32> to vector<32x128xf32>
    %265 = arith.mulf %264, %10 : vector<32x128xf32>
    %266 = arith.subf %263, %265 : vector<32x128xf32>
    %cst_98 = arith.constant 0.000000e+00 : f32
    %267 = vector.broadcast %cst_98 : f32 to vector<32x128xf32>
    %268 = arith.maximumf %266, %267 : vector<32x128xf32>
    %269 = arith.mulf %268, %12 : vector<32x128xf32>
    %cst_99 = arith.constant dense<0.000000e+00> : vector<128xf32>
    %270 = vector.multi_reduction <add>, %269, %cst_99 [0] : vector<32x128xf32> to vector<128xf32>
    %271 = vector.shape_cast %270 : vector<128xf32> to vector<1x128xf32>
    %c7_i32_100 = arith.constant 7 : i32
    %272 = arith.addi %6, %c7_i32_100 : i32
    %273 = arith.index_cast %272 : i32 to index
    %c0_101 = arith.constant 0 : index
    %274 = vector.load %arg7[%273, %c0_101] : memref<8x128xf32, #tpu.memory_space<vmem>>, vector<1x128xf32>
    tpu.vector_store %arg7[%273, %c0_101], %271 {strides = array<i32>} : memref<8x128xf32, #tpu.memory_space<vmem>>, vector<1x128xf32>,
    %275 = vector.broadcast %248 : vector<1x128xf32> to vector<32x128xf32>
    %276 = arith.addf %244, %275 : vector<32x128xf32>
    %277 = arith.subf %276, %260 : vector<32x128xf32>
    %278 = arith.mulf %268, %14 : vector<32x128xf32>
    %c1_i32_102 = arith.constant 1 : i32
    %c0_103 = arith.constant 0 : index
    %c0_104 = arith.constant 0 : index
    %279 = vector.load %arg8[%c0_103, %c0_104] : memref<32x128xf32, #tpu.memory_space<vmem>>, vector<32x128xf32>
    tpu.vector_store %arg8[%c0_103, %c0_104], %277 {strides = array<i32>} : memref<32x128xf32, #tpu.memory_space<vmem>>, vector<32x128xf32>,
    %c0_105 = arith.constant 0 : index
    %c0_106 = arith.constant 0 : index
    %280 = vector.load %arg9[%c0_105, %c0_106] : memref<32x128xf32, #tpu.memory_space<vmem>>, vector<32x128xf32>
    tpu.vector_store %arg9[%c0_105, %c0_106], %278 {strides = array<i32>} : memref<32x128xf32, #tpu.memory_space<vmem>>, vector<32x128xf32>,
    return
  }
  func.func @transform_0(%arg0: i32, %arg1: i32) -> (i32, i32) {
    %c0_i32 = arith.constant 0 : i32
    return %arg1, %arg0 : i32, i32
  }
  func.func @transform_1(%arg0: i32, %arg1: i32) -> (i32, i32) {
    %c0_i32 = arith.constant 0 : i32
    return %arg1, %arg0 : i32, i32
  }
  func.func @transform_2(%arg0: i32, %arg1: i32) -> (i32, i32) {
    %c0_i32 = arith.constant 0 : i32
    return %arg1, %arg0 : i32, i32
  }
  func.func @transform_3(%arg0: i32, %arg1: i32) -> (i32, i32) {
    %c0_i32 = arith.constant 0 : i32
    return %arg1, %arg0 : i32, i32
  }
  func.func @transform_4(%arg0: i32, %arg1: i32) -> (i32, i32, i32) {
    %c0_i32 = arith.constant 0 : i32
    %c0_i32_0 = arith.constant 0 : i32
    %c0_i32_1 = arith.constant 0 : i32
    return %c0_i32, %c0_i32_0, %arg0 : i32, i32, i32
  }
  func.func @transform_5(%arg0: i32, %arg1: i32) -> (i32, i32) {
    %c0_i32 = arith.constant 0 : i32
    return %arg1, %arg0 : i32, i32
  }
}

</mosaic_0001>

<bundles_post_ra>
// kernel: tpu_custom_call.1
= control target key start
LH: loop header
LB: loop body
LE: loop exit
PB: predicated region body
PF: predicated region fallthrough
CT: control target
= control target key end

     0   :  { %10 = vsyncpa [#allocation5], 0  ;;  %s1133_s0 = inlined_call_operand.hbm [shape: f32[8,128], index: 0, kind: input, shape index: {}]   ;;  %s1134_s1 = inlined_call_operand.hbm [shape: f32[8,128], index: 1, kind: input, shape index: {}]   ;;  %s1135_s2 = inlined_call_operand.hbm [shape: f32[8,128], index: 2, kind: input, shape index: {}]   ;;  %s1136_s3 = inlined_call_operand.hbm [shape: f32[8,128], index: 3, kind: input, shape index: {}]   ;;  %s1137_s4 = inlined_call_operand.hbm [shape: f32[4,32,128], index: 4, kind: input, shape index: {}]   ;;  %s1138_s5 = inlined_call_operand.hbm [shape: f32[8,128], index: 5, kind: output, shape index: {}]  }
   0x1   :  { %11 = vsyncpa [#allocation8], 0 }
   0x2   :  { %12 = vsyncpa [#allocation11], 0  ;;  %s30_s20 = sshll.u32 %s1134_s1, 4  ;;  %s31_s20 = int_to_ptr.hbm [resolvable:$true] %s30_s20 }
   0x3   :  { %13 = vsyncpa [#allocation6], 0  ;;  %s921_s21 = smov [#allocation7]   ;;  %s52_s25 = sshll.u32 %s1136_s3, 4  ;;  %s53_s25 = int_to_ptr.hbm [resolvable:$true] %s52_s25 }
   0x4   :  { %s32_s22 = sshll.u32 %s921_s21, 4  ;;  %s922_s26 = smov [#allocation10]   ;;  %s33_s22 = int_to_ptr.vmem [resolvable:$true] %s32_s22 }
   0x5   :  { %35 = dma.hbm_to_vmem [thread:$0]  %s31_s20, 128, %s33_s22, [#allocation8]  }
   0x6   :  { %s54_s27 = sshll.u32 %s922_s26, 4  ;;  %s19_s30 = sshll.u32 %s1133_s0, 4  ;;  %s55_s27 = int_to_ptr.vmem [resolvable:$true] %s54_s27  ;;  %s20_s30 = int_to_ptr.hbm [resolvable:$true] %s19_s30 }
   0x7   :  { %57 = dma.hbm_to_vmem [thread:$0]  %s53_s25, 128, %s55_s27, [#allocation11]  }
   0x8   :  { %s41_s7 = sshll.u32 %s1135_s2, 4  ;;  %s923_s8 = smov [#allocation4]   ;;  %s42_s7 = int_to_ptr.hbm [resolvable:$true] %s41_s7 }
   0x9   :  { %s21_s9 = sshll.u32 %s923_s8, 4  ;;  %s924_s3 = smov [#allocation9]   ;;  %s22_s9 = int_to_ptr.vmem [resolvable:$true] %s21_s9 }
   0xa   :  { %24 = dma.hbm_to_vmem [thread:$0]  %s20_s30, 128, %s22_s9, [#allocation5]  }
   0xb   :  { %s43_s10 = sshll.u32 %s924_s3, 4  ;;  %s62_s13 = sshll.u32 %s1137_s4, 4  ;;  %s44_s10 = int_to_ptr.vmem [resolvable:$true] %s43_s10  ;;  %s63_s13 = int_to_ptr.hbm [resolvable:$true] %s62_s13 }
   0xc   :  { %46 = dma.hbm_to_vmem [thread:$0]  %s42_s7, 128, %s44_s10, [#allocation8]  }
   0xd   :  { %s925_s0 = smov [#allocation12]   ;;  %s926_s15 = smov 128  }
   0xe   :  { %s64_s14 = sshll.u32 %s925_s0, 4  ;;  %s927_s16 = smov 8   ;;  %s65_s14 = int_to_ptr.vmem [resolvable:$true] %s64_s14 }
   0xf   :  { %70 = dma.hbm_to_vmem [thread:$0]  %s63_s13, 2048, %s65_s14, [#allocation11], %s926_s15, %s926_s15, %s927_s16  }
  0x10   :  { %913 = dma.done.wait [#allocation5], 128  }
  0x11   :  { %914 = vsyncadd [#allocation5], 4294967168 }
  0x12   :  { %915 = dma.done.wait [#allocation8], 256  }
  0x13   :  { %916 = vsyncadd [#allocation8], 4294967040 }
  0x14   :  { %917 = dma.done.wait [#allocation11], 2176  }
  0x15   :  { %918 = vsyncadd [#allocation11], 4294965120  ;;  %v974_v0 = vld [vmem:[#allocation12] sm:$0xff]  ;;  %v976_v1 = vld [vmem:[#allocation12 + $0x8] sm:$0xff]  ;;  %s928_s2 = smov [#allocation13]   ;;  %s683_s19 = sshll.u32 %s1138_s5, 4  ;;  %s684_s19 = int_to_ptr.hbm [resolvable:$true] %s683_s19 }
  0x16   :  { %v978_v2 = vld [vmem:[#allocation12 + $0x10] sm:$0xff]  ;;  %v980_v3 = vld [vmem:[#allocation12 + $0x18] sm:$0xff]  ;;  %v982_v4 = vld [vmem:[#allocation12 + $0x20] sm:$0xff]  ;;  %s681_s4 = sshll.u32 %s928_s2, 4  ;;  %s682_s4 = int_to_ptr.vmem [resolvable:$true] %s681_s4 }
  0x17   :  { %v984_v5 = vld [vmem:[#allocation12 + $0x28] sm:$0xff]  ;;  %v986_v6 = vld [vmem:[#allocation12 + $0x30] sm:$0xff]  ;;  %v988_v7 = vld [vmem:[#allocation12 + $0x38] sm:$0xff] }
  0x18   :  { %v738_v8 = vld [vmem:[#allocation10] ss:$0 sm:$0xff]  ;;  %v739_v9 = vld [vmem:[#allocation7] ss:$0 sm:$0xff]  ;;  %v740_v10 = vld [vmem:[#allocation9] ss:$0 sm:$0xff] }
  0x19   :  { %v135_v11 = vmul.f32 %v738_v8, %v974_v0  ;;  %v136_v12 = vmul.f32 %v738_v8, %v976_v1  ;;  %v137_v13 = vmul.f32 %v738_v8, %v978_v2  ;;  %v138_v14 = vmul.f32 %v738_v8, %v980_v3  ;;  %v742_v15 = vld [vmem:[#allocation10 + $0x1] ss:$0 sm:$0xff]  ;;  %v741_v20 = vld [vmem:[#allocation4] ss:$0 sm:$0xff]  ;;  %v1004_v34 = vld [vmem:[#allocation12 + $0x48] sm:$0xff] }
  0x1a   :  { %v153_v16 = vmul.f32 %v740_v10, %v982_v4  ;;  %v154_v17 = vmul.f32 %v740_v10, %v984_v5  ;;  %v155_v18 = vmul.f32 %v740_v10, %v986_v6  ;;  %v156_v19 = vmul.f32 %v740_v10, %v988_v7  ;;  %v1002_v33 = vld [vmem:[#allocation12 + $0x40] sm:$0xff]  ;;  %v1006_v35 = vld [vmem:[#allocation12 + $0x50] sm:$0xff]  ;;  %v1008_v36 = vld [vmem:[#allocation12 + $0x58] sm:$0xff] }
  0x1b   :  { %v139_v21 = vmin.f32 %v135_v11, 0.0  ;;  %v140_v22 = vmin.f32 %v136_v12, 0.0  ;;  %v141_v23 = vmin.f32 %v137_v13, 0.0  ;;  %v142_v24 = vmin.f32 %v138_v14, 0.0  ;;  %v743_v41 = vld [vmem:[#allocation4 + $0x1] ss:$0 sm:$0xff] }
  0x1c   :  { %v202_v25 = vmul.f32 %v742_v15, %v974_v0  ;;  %v203_v26 = vmul.f32 %v742_v15, %v976_v1  ;;  %v204_v27 = vmul.f32 %v742_v15, %v978_v2  ;;  %v205_v28 = vmul.f32 %v742_v15, %v980_v3  ;;  %v1010_v42 = vld [vmem:[#allocation12 + $0x60] sm:$0xff]  ;;  %v1012_v43 = vld [vmem:[#allocation12 + $0x68] sm:$0xff]  ;;  %v1014_v44 = vld [vmem:[#allocation12 + $0x70] sm:$0xff] }
  0x1d   :  { %v148_v29 = vadd.f32 %v739_v9, %v139_v21  ;;  %v149_v30 = vadd.f32 %v739_v9, %v140_v22  ;;  %v150_v31 = vadd.f32 %v739_v9, %v141_v23  ;;  %v151_v32 = vadd.f32 %v739_v9, %v142_v24  ;;  %v1016_v49 = vld [vmem:[#allocation12 + $0x78] sm:$0xff]  ;;  %v745_v58 = vld [vmem:[#allocation9 + $0x1] ss:$0 sm:$0xff]  ;;  %v744_v63 = vld [vmem:[#allocation7 + $0x1] ss:$0 sm:$0xff] }
  0x1e   :  { %v184_v37 = vsub.f32 %v741_v20, %v139_v21  ;;  %v185_v38 = vsub.f32 %v741_v20, %v140_v22  ;;  %v186_v39 = vsub.f32 %v741_v20, %v141_v23  ;;  %v187_v40 = vsub.f32 %v741_v20, %v142_v24  ;;  %v746_v20 = vld [vmem:[#allocation10 + $0x2] ss:$0 sm:$0xff] }
  0x1f   :  { %v157_v45 = vsub.f32 %v148_v29, %v153_v16  ;;  %v158_v46 = vsub.f32 %v149_v30, %v154_v17  ;;  %v159_v47 = vsub.f32 %v150_v31, %v155_v18  ;;  %v160_v48 = vsub.f32 %v151_v32, %v156_v19 }
  0x20   :  { %v206_v50 = vmin.f32 %v184_v37, %v202_v25  ;;  %v207_v51 = vmin.f32 %v185_v38, %v203_v26  ;;  %v208_v52 = vmin.f32 %v186_v39, %v204_v27  ;;  %v209_v53 = vmin.f32 %v187_v40, %v205_v28 }
  0x21   :  { %v161_v54 = vmax.f32 %v157_v45, 0.0  ;;  %v162_v55 = vmax.f32 %v158_v46, 0.0  ;;  %v163_v56 = vmax.f32 %v159_v47, 0.0  ;;  %v164_v57 = vmax.f32 %v160_v48, 0.0 }
  0x22   :  { %v248_v59 = vadd.f32 %v743_v41, %v184_v37  ;;  %v249_v60 = vadd.f32 %v743_v41, %v185_v38  ;;  %v250_v61 = vadd.f32 %v743_v41, %v186_v39  ;;  %v251_v62 = vadd.f32 %v743_v41, %v187_v40 }
  0x23   :  { %v165_v8 = vmul.f32 %v161_v54, %v1002_v33  ;;  %v166_v9 = vmul.f32 %v162_v55, %v1004_v34  ;;  %v167_v10 = vmul.f32 %v163_v56, %v1006_v35  ;;  %v168_v11 = vmul.f32 %v164_v57, %v1008_v36 }
  0x24   :  { %v188_v12 = vmul.f32 %v161_v54, %v1010_v42  ;;  %v189_v13 = vmul.f32 %v162_v55, %v1012_v43  ;;  %v190_v14 = vmul.f32 %v163_v56, %v1014_v44  ;;  %v191_v15 = vmul.f32 %v164_v57, %v1016_v49 }
  0x25   :  { %v169_v16 = vadd.f32 %v166_v9, %v165_v8  ;;  %v220_v17 = vmul.f32 %v745_v58, %v982_v4  ;;  %v221_v18 = vmul.f32 %v745_v58, %v984_v5  ;;  %v222_v19 = vmul.f32 %v745_v58, %v986_v6 }
  0x26   :  { %v210_v21 = vadd.f32 %v206_v50, %v188_v12  ;;  %v211_v22 = vadd.f32 %v207_v51, %v189_v13  ;;  %v212_v23 = vadd.f32 %v208_v52, %v190_v14  ;;  %v213_v24 = vadd.f32 %v209_v53, %v191_v15  ;;  %v747_v14 = vld [vmem:[#allocation7 + $0x2] ss:$0 sm:$0xff] }
  0x27   :  { %v170_v25 = vadd.f32 %v169_v16, %v167_v10  ;;  %v223_v26 = vmul.f32 %v745_v58, %v988_v7  ;;  %v252_v27 = vsub.f32 %v248_v59, %v206_v50  ;;  %v253_v28 = vsub.f32 %v249_v60, %v207_v51  ;;  %v748_v59 = vld [vmem:[#allocation9 + $0x2] ss:$0 sm:$0xff] }
  0x28   :  { %v215_v29 = vadd.f32 %v744_v63, %v210_v21  ;;  %v216_v30 = vadd.f32 %v744_v63, %v211_v22  ;;  %v217_v31 = vadd.f32 %v744_v63, %v212_v23  ;;  %v218_v32 = vadd.f32 %v744_v63, %v213_v24 }
  0x29   :  { %v171_v37 = vadd.f32 %v170_v25, %v168_v11  ;;  %v254_v38 = vsub.f32 %v250_v61, %v208_v52  ;;  %v255_v39 = vsub.f32 %v251_v62, %v209_v53  ;;  %v270_v40 = vmul.f32 %v746_v20, %v974_v0 }
  0x2a   :  { %v224_v41 = vsub.f32 %v215_v29, %v220_v17  ;;  %v225_v45 = vsub.f32 %v216_v30, %v221_v18  ;;  %v226_v46 = vsub.f32 %v217_v31, %v222_v19  ;;  %v227_v47 = vsub.f32 %v218_v32, %v223_v26  ;;  %v749_v19 = vld [vmem:[#allocation4 + $0x2] ss:$0 sm:$0xff] }
  0x2b   :  { %v172_v48 = vrot.slane %v171_v37, 4  ;;  %v271_v54 = vmul.f32 %v746_v20, %v976_v1  ;;  %v272_v55 = vmul.f32 %v746_v20, %v978_v2  ;;  %v273_v50 = vmul.f32 %v746_v20, %v980_v3 }
  0x2c   :  { %v228_v51 = vmax.f32 %v224_v41, 0.0  ;;  %v229_v56 = vmax.f32 %v225_v45, 0.0  ;;  %v230_v57 = vmax.f32 %v226_v46, 0.0  ;;  %v231_v58 = vmax.f32 %v227_v47, 0.0 }
  0x2d   :  { %v173_v52 = vadd.f32 %v172_v48, %v171_v37  ;;  %v274_v53 = vmin.f32 %v252_v27, %v270_v40  ;;  %v275_v60 = vmin.f32 %v253_v28, %v271_v54  ;;  %v276_v61 = vmin.f32 %v254_v38, %v272_v55 }
  0x2e   :  { %v232_v62 = vmul.f32 %v228_v51, %v1002_v33  ;;  %v233_v63 = vmul.f32 %v229_v56, %v1004_v34  ;;  %v234_v8 = vmul.f32 %v230_v57, %v1006_v35  ;;  %v235_v9 = vmul.f32 %v231_v58, %v1008_v36 }
  0x2f   :  { %v174_v10 = vrot.slane %v173_v52, 2  ;;  %v256_v11 = vmul.f32 %v228_v51, %v1010_v42  ;;  %v257_v12 = vmul.f32 %v229_v56, %v1012_v43  ;;  %v258_v13 = vmul.f32 %v230_v57, %v1014_v44 }
  0x30   :  { %v236_v15 = vadd.f32 %v233_v63, %v232_v62  ;;  %v259_v16 = vmul.f32 %v231_v58, %v1016_v49  ;;  %v277_v17 = vmin.f32 %v255_v39, %v273_v50  ;;  %v288_v18 = vmul.f32 %v748_v59, %v982_v4 }
  0x31   :  { %v175_v20 = vadd.f32 %v174_v10, %v173_v52  ;;  %v278_v21 = vadd.f32 %v274_v53, %v256_v11  ;;  %v279_v22 = vadd.f32 %v275_v60, %v257_v12  ;;  %v280_v23 = vadd.f32 %v276_v61, %v258_v13  ;;  %v750_v12 = vld [vmem:[#allocation10 + $0x3] ss:$0 sm:$0xff] }
  0x32   :  { %v237_v24 = vadd.f32 %v236_v15, %v234_v8  ;;  %v281_v25 = vadd.f32 %v277_v17, %v259_v16  ;;  %v289_v26 = vmul.f32 %v748_v59, %v984_v5  ;;  %v290_v29 = vmul.f32 %v748_v59, %v986_v6  ;;  %v752_v15 = vld [vmem:[#allocation9 + $0x3] ss:$0 sm:$0xff] }
  0x33   :  { %v176_v30 = vrot.slane %v175_v20, 1  ;;  %v283_v31 = vadd.f32 %v747_v14, %v278_v21  ;;  %v284_v32 = vadd.f32 %v747_v14, %v279_v22  ;;  %v285_v37 = vadd.f32 %v747_v14, %v280_v23 }
  0x34   :  { %v238_v40 = vadd.f32 %v237_v24, %v235_v9  ;;  %v286_v41 = vadd.f32 %v747_v14, %v281_v25  ;;  %v291_v45 = vmul.f32 %v748_v59, %v988_v7  ;;  %v316_v46 = vadd.f32 %v749_v19, %v252_v27 }
  0x35   :  { %v177_v47 = vadd.f32 %v176_v30, %v175_v20  ;;  %v292_v48 = vsub.f32 %v283_v31, %v288_v18  ;;  %v293_v54 = vsub.f32 %v284_v32, %v289_v26  ;;  %v294_v55 = vsub.f32 %v285_v37, %v290_v29  ;;  %v753_v26 = vld [vmem:[#allocation4 + $0x3] ss:$0 sm:$0xff]  ;;  %v751_v37 = vld [vmem:[#allocation7 + $0x3] ss:$0 sm:$0xff] }
  0x36   :  { %v239_v50 = vrot.slane %v238_v40, 4  ;;  %v295_v51 = vsub.f32 %v286_v41, %v291_v45  ;;  %v317_v56 = vadd.f32 %v749_v19, %v253_v28  ;;  %v318_v57 = vadd.f32 %v749_v19, %v254_v38 }
  0x37   :  { %178 = vst [vmem:[#allocation13] sm:$0x1] %v177_v47  ;;  %v296_v58 = vmax.f32 %v292_v48, 0.0  ;;  %v297_v52 = vmax.f32 %v293_v54, 0.0  ;;  %v298_v62 = vmax.f32 %v294_v55, 0.0  ;;  %v319_v63 = vadd.f32 %v749_v19, %v255_v39 }
  0x38   :  { %v240_v8 = vadd.f32 %v239_v50, %v238_v40  ;;  %v299_v10 = vmax.f32 %v295_v51, 0.0  ;;  %v320_v9 = vsub.f32 %v316_v46, %v274_v53  ;;  %v321_v11 = vsub.f32 %v317_v56, %v275_v60 }
  0x39   :  { %v300_v27 = vmul.f32 %v296_v58, %v1002_v33  ;;  %v301_v59 = vmul.f32 %v297_v52, %v1004_v34  ;;  %v302_v13 = vmul.f32 %v298_v62, %v1006_v35  ;;  %v322_v14 = vsub.f32 %v318_v57, %v276_v61 }
  0x3a   :  { %v241_v28 = vrot.slane %v240_v8, 2  ;;  %v303_v38 = vmul.f32 %v299_v10, %v1008_v36  ;;  %v323_v16 = vsub.f32 %v319_v63, %v277_v17  ;;  %v324_v18 = vmul.f32 %v296_v58, %v1010_v42 }
  0x3b   :  { %v304_v39 = vadd.f32 %v301_v59, %v300_v27  ;;  %v325_v19 = vmul.f32 %v297_v52, %v1012_v43  ;;  %v326_v53 = vmul.f32 %v298_v62, %v1014_v44  ;;  %v327_v60 = vmul.f32 %v299_v10, %v1016_v49 }
  0x3c   :  { %v242_v20 = vadd.f32 %v241_v28, %v240_v8  ;;  %v338_v21 = vmul.f32 %v750_v12, %v974_v0  ;;  %v339_v22 = vmul.f32 %v750_v12, %v976_v1  ;;  %v340_v61 = vmul.f32 %v750_v12, %v978_v2  ;;  %v754_v8 = vld [vmem:[#allocation10 + $0x4] ss:$0 sm:$0xff] }
  0x3d   :  { %v305_v23 = vadd.f32 %v304_v39, %v302_v13  ;;  %v341_v24 = vmul.f32 %v750_v12, %v980_v3  ;;  %v356_v17 = vmul.f32 %v752_v15, %v982_v4  ;;  %v357_v25 = vmul.f32 %v752_v15, %v984_v5 }
  0x3e   :  { %v243_v29 = vrot.slane %v242_v20, 1  ;;  %v342_v30 = vmin.f32 %v320_v9, %v338_v21  ;;  %v343_v31 = vmin.f32 %v321_v11, %v339_v22  ;;  %v344_v32 = vmin.f32 %v322_v14, %v340_v61  ;;  %v756_v61 = vld [vmem:[#allocation9 + $0x4] ss:$0 sm:$0xff] }
  0x3f   :  { %v306_v40 = vadd.f32 %v305_v23, %v303_v38  ;;  %v345_v41 = vmin.f32 %v323_v16, %v341_v24  ;;  %v358_v45 = vmul.f32 %v752_v15, %v986_v6  ;;  %v359_v46 = vmul.f32 %v752_v15, %v988_v7 }
  0x40   :  { %v244_v47 = vadd.f32 %v243_v29, %v242_v20  ;;  %v346_v48 = vadd.f32 %v342_v30, %v324_v18  ;;  %v347_v54 = vadd.f32 %v343_v31, %v325_v19  ;;  %v348_v55 = vadd.f32 %v344_v32, %v326_v53 }
  0x41   :  { %v307_v50 = vrot.slane %v306_v40, 4  ;;  %v349_v51 = vadd.f32 %v345_v41, %v327_v60  ;;  %v384_v56 = vadd.f32 %v753_v26, %v320_v9  ;;  %v385_v57 = vadd.f32 %v753_v26, %v321_v11 }
  0x42   :  { %246 = vst [vmem:[#allocation13 + $0x1] sm:$0x1] %v244_v47  ;;  %v351_v58 = vadd.f32 %v751_v37, %v346_v48  ;;  %v352_v52 = vadd.f32 %v751_v37, %v347_v54  ;;  %v353_v62 = vadd.f32 %v751_v37, %v348_v55  ;;  %v386_v63 = vadd.f32 %v753_v26, %v322_v14 }
  0x43   :  { %v308_v10 = vadd.f32 %v307_v50, %v306_v40  ;;  %v354_v12 = vadd.f32 %v751_v37, %v349_v51  ;;  %v387_v27 = vadd.f32 %v753_v26, %v323_v16  ;;  %v388_v59 = vsub.f32 %v384_v56, %v342_v30 }
  0x44   :  { %v360_v13 = vsub.f32 %v351_v58, %v356_v17  ;;  %v361_v15 = vsub.f32 %v352_v52, %v357_v25  ;;  %v362_v28 = vsub.f32 %v353_v62, %v358_v45  ;;  %v389_v38 = vsub.f32 %v385_v57, %v343_v31  ;;  %v755_v45 = vld [vmem:[#allocation7 + $0x4] ss:$0 sm:$0xff] }
  0x45   :  { %v309_v18 = vrot.slane %v308_v10, 2  ;;  %v363_v39 = vsub.f32 %v354_v12, %v359_v46  ;;  %v390_v19 = vsub.f32 %v386_v63, %v344_v32  ;;  %v391_v53 = vsub.f32 %v387_v27, %v345_v41  ;;  %v757_v46 = vld [vmem:[#allocation4 + $0x4] ss:$0 sm:$0xff] }
  0x46   :  { %v364_v9 = vmax.f32 %v360_v13, 0.0  ;;  %v365_v11 = vmax.f32 %v361_v15, 0.0  ;;  %v366_v60 = vmax.f32 %v362_v28, 0.0  ;;  %v406_v20 = vmul.f32 %v754_v8, %v974_v0 }
  0x47   :  { %v310_v21 = vadd.f32 %v309_v18, %v308_v10  ;;  %v367_v14 = vmax.f32 %v363_v39, 0.0  ;;  %v407_v22 = vmul.f32 %v754_v8, %v976_v1  ;;  %v408_v16 = vmul.f32 %v754_v8, %v978_v2  ;;  %v758_v39 = vld [vmem:[#allocation10 + $0x5] ss:$0 sm:$0xff] }
  0x48   :  { %v368_v23 = vmul.f32 %v364_v9, %v1002_v33  ;;  %v369_v24 = vmul.f32 %v365_v11, %v1004_v34  ;;  %v370_v17 = vmul.f32 %v366_v60, %v1006_v35  ;;  %v392_v25 = vmul.f32 %v364_v9, %v1010_v42 }
  0x49   :  { %v311_v26 = vrot.slane %v310_v21, 1  ;;  %v371_v29 = vmul.f32 %v367_v14, %v1008_v36  ;;  %v393_v30 = vmul.f32 %v365_v11, %v1012_v43  ;;  %v394_v31 = vmul.f32 %v366_v60, %v1014_v44 }
  0x4a   :  { %v372_v32 = vadd.f32 %v369_v24, %v368_v23  ;;  %v395_v37 = vmul.f32 %v367_v14, %v1016_v49  ;;  %v409_v40 = vmul.f32 %v754_v8, %v980_v3  ;;  %v410_v41 = vmin.f32 %v388_v59, %v406_v20 }
  0x4b   :  { %v312_v47 = vadd.f32 %v311_v26, %v310_v21  ;;  %v411_v48 = vmin.f32 %v389_v38, %v407_v22  ;;  %v412_v54 = vmin.f32 %v390_v19, %v408_v16  ;;  %v424_v55 = vmul.f32 %v756_v61, %v982_v4 }
  0x4c   :  { %v373_v50 = vadd.f32 %v372_v32, %v370_v17  ;;  %v413_v51 = vmin.f32 %v391_v53, %v409_v40  ;;  %v414_v56 = vadd.f32 %v410_v41, %v392_v25  ;;  %v425_v57 = vmul.f32 %v756_v61, %v984_v5 }
  0x4d   :  { %314 = vst [vmem:[#allocation13 + $0x2] sm:$0x1] %v312_v47  ;;  %v415_v58 = vadd.f32 %v411_v48, %v393_v30  ;;  %v416_v52 = vadd.f32 %v412_v54, %v394_v31  ;;  %v426_v62 = vmul.f32 %v756_v61, %v986_v6  ;;  %v427_v63 = vmul.f32 %v756_v61, %v988_v7 }
  0x4e   :  { %v374_v8 = vadd.f32 %v373_v50, %v371_v29  ;;  %v417_v10 = vadd.f32 %v413_v51, %v395_v37  ;;  %v419_v12 = vadd.f32 %v755_v45, %v414_v56  ;;  %v452_v27 = vadd.f32 %v757_v46, %v388_v59  ;;  %v759_v56 = vld [vmem:[#allocation7 + $0x5] ss:$0 sm:$0xff] }
  0x4f   :  { %v420_v13 = vadd.f32 %v755_v45, %v415_v58  ;;  %v421_v15 = vadd.f32 %v755_v45, %v416_v52  ;;  %v453_v28 = vadd.f32 %v757_v46, %v389_v38  ;;  %v454_v18 = vadd.f32 %v757_v46, %v390_v19 }
  0x50   :  { %v375_v9 = vrot.slane %v374_v8, 4  ;;  %v422_v11 = vadd.f32 %v755_v45, %v417_v10  ;;  %v428_v60 = vsub.f32 %v419_v12, %v424_v55  ;;  %v455_v20 = vadd.f32 %v757_v46, %v391_v53  ;;  %v760_v53 = vld [vmem:[#allocation9 + $0x5] ss:$0 sm:$0xff] }
  0x51   :  { %v429_v21 = vsub.f32 %v420_v13, %v425_v57  ;;  %v430_v14 = vsub.f32 %v421_v15, %v426_v62  ;;  %v456_v22 = vsub.f32 %v452_v27, %v410_v41  ;;  %v457_v16 = vsub.f32 %v453_v28, %v411_v48 }
  0x52   :  { %v376_v23 = vadd.f32 %v375_v9, %v374_v8  ;;  %v431_v24 = vsub.f32 %v422_v11, %v427_v63  ;;  %v432_v61 = vmax.f32 %v428_v60, 0.0  ;;  %v458_v17 = vsub.f32 %v454_v18, %v412_v54  ;;  %v761_v63 = vld [vmem:[#allocation4 + $0x5] ss:$0 sm:$0xff] }
  0x53   :  { %v433_v25 = vmax.f32 %v429_v21, 0.0  ;;  %v434_v26 = vmax.f32 %v430_v14, 0.0  ;;  %v459_v59 = vsub.f32 %v455_v20, %v413_v51  ;;  %v474_v29 = vmul.f32 %v758_v39, %v974_v0 }
  0x54   :  { %v377_v38 = vrot.slane %v376_v23, 2  ;;  %v435_v19 = vmax.f32 %v431_v24, 0.0  ;;  %v436_v30 = vmul.f32 %v432_v61, %v1002_v33  ;;  %v460_v31 = vmul.f32 %v432_v61, %v1010_v42  ;;  %v762_v24 = vld [vmem:[#allocation10 + $0x6] ss:$0 sm:$0xff] }
  0x55   :  { %v437_v32 = vmul.f32 %v433_v25, %v1004_v34  ;;  %v438_v37 = vmul.f32 %v434_v26, %v1006_v35  ;;  %v461_v40 = vmul.f32 %v433_v25, %v1012_v43  ;;  %v462_v41 = vmul.f32 %v434_v26, %v1014_v44 }
  0x56   :  { %v378_v45 = vadd.f32 %v377_v38, %v376_v23  ;;  %v439_v46 = vmul.f32 %v435_v19, %v1008_v36  ;;  %v463_v47 = vmul.f32 %v435_v19, %v1016_v49  ;;  %v475_v48 = vmul.f32 %v758_v39, %v976_v1 }
  0x57   :  { %v440_v54 = vadd.f32 %v437_v32, %v436_v30  ;;  %v476_v55 = vmul.f32 %v758_v39, %v978_v2  ;;  %v477_v50 = vmul.f32 %v758_v39, %v980_v3  ;;  %v478_v51 = vmin.f32 %v456_v22, %v474_v29 }
  0x58   :  { %v379_v57 = vrot.slane %v378_v45, 1  ;;  %v479_v58 = vmin.f32 %v457_v16, %v475_v48  ;;  %v492_v52 = vmul.f32 %v760_v53, %v982_v4  ;;  %v493_v62 = vmul.f32 %v760_v53, %v984_v5 }
  0x59   :  { %v441_v8 = vadd.f32 %v440_v54, %v438_v37  ;;  %v480_v10 = vmin.f32 %v458_v17, %v476_v55  ;;  %v481_v12 = vmin.f32 %v459_v59, %v477_v50  ;;  %v482_v27 = vadd.f32 %v478_v51, %v460_v31  ;;  %v764_v54 = vld [vmem:[#allocation9 + $0x6] ss:$0 sm:$0xff] }
  0x5a   :  { %v380_v13 = vadd.f32 %v379_v57, %v378_v45  ;;  %v483_v15 = vadd.f32 %v479_v58, %v461_v40  ;;  %v494_v28 = vmul.f32 %v760_v53, %v986_v6  ;;  %v495_v18 = vmul.f32 %v760_v53, %v988_v7 }
  0x5b   :  { %v442_v39 = vadd.f32 %v441_v8, %v439_v46  ;;  %v484_v9 = vadd.f32 %v480_v10, %v462_v41  ;;  %v485_v11 = vadd.f32 %v481_v12, %v463_v47  ;;  %v487_v60 = vadd.f32 %v759_v56, %v482_v27 }
  0x5c   :  { %382 = vst [vmem:[#allocation13 + $0x3] sm:$0x1] %v380_v13  ;;  %v488_v20 = vadd.f32 %v759_v56, %v483_v15  ;;  %v520_v21 = vadd.f32 %v761_v63, %v456_v22  ;;  %v521_v14 = vadd.f32 %v761_v63, %v457_v16  ;;  %v522_v23 = vadd.f32 %v761_v63, %v458_v17  ;;  %v763_v15 = vld [vmem:[#allocation7 + $0x6] ss:$0 sm:$0xff] }
  0x5d   :  { %v443_v61 = vrot.slane %v442_v39, 4  ;;  %v489_v25 = vadd.f32 %v759_v56, %v484_v9  ;;  %v490_v26 = vadd.f32 %v759_v56, %v485_v11  ;;  %v496_v29 = vsub.f32 %v487_v60, %v492_v52 }
  0x5e   :  { %v497_v38 = vsub.f32 %v488_v20, %v493_v62  ;;  %v523_v19 = vadd.f32 %v761_v63, %v459_v59  ;;  %v524_v30 = vsub.f32 %v520_v21, %v478_v51  ;;  %v525_v31 = vsub.f32 %v521_v14, %v479_v58 }
  0x5f   :  { %v444_v32 = vadd.f32 %v443_v61, %v442_v39  ;;  %v498_v53 = vsub.f32 %v489_v25, %v494_v28  ;;  %v499_v37 = vsub.f32 %v490_v26, %v495_v18  ;;  %v500_v40 = vmax.f32 %v496_v29, 0.0  ;;  %v765_v18 = vld [vmem:[#allocation4 + $0x6] ss:$0 sm:$0xff] }
  0x60   :  { %v501_v41 = vmax.f32 %v497_v38, 0.0  ;;  %v526_v45 = vsub.f32 %v522_v23, %v480_v10  ;;  %v527_v46 = vsub.f32 %v523_v19, %v481_v12  ;;  %v542_v22 = vmul.f32 %v762_v24, %v974_v0 }
  0x61   :  { %v445_v16 = vrot.slane %v444_v32, 2  ;;  %v502_v17 = vmax.f32 %v498_v53, 0.0  ;;  %v503_v47 = vmax.f32 %v499_v37, 0.0  ;;  %v504_v48 = vmul.f32 %v500_v40, %v1002_v33 }
  0x62   :  { %v505_v55 = vmul.f32 %v501_v41, %v1004_v34  ;;  %v528_v59 = vmul.f32 %v500_v40, %v1010_v42  ;;  %v529_v50 = vmul.f32 %v501_v41, %v1012_v43  ;;  %v543_v51 = vmul.f32 %v762_v24, %v976_v1 }
  0x63   :  { %v446_v56 = vadd.f32 %v445_v16, %v444_v32  ;;  %v506_v57 = vmul.f32 %v502_v17, %v1006_v35  ;;  %v507_v58 = vmul.f32 %v503_v47, %v1008_v36  ;;  %v530_v52 = vmul.f32 %v502_v17, %v1014_v44 }
  0x64   :  { %v508_v62 = vadd.f32 %v505_v55, %v504_v48  ;;  %v531_v63 = vmul.f32 %v503_v47, %v1016_v49  ;;  %v544_v8 = vmul.f32 %v762_v24, %v978_v2  ;;  %v545_v10 = vmul.f32 %v762_v24, %v980_v3 }
  0x65   :  { %v447_v12 = vrot.slane %v446_v56, 1  ;;  %v546_v27 = vmin.f32 %v524_v30, %v542_v22  ;;  %v547_v13 = vmin.f32 %v525_v31, %v543_v51  ;;  %v560_v28 = vmul.f32 %v764_v54, %v982_v4  ;;  %v766_v22 = vld [vmem:[#allocation10 + $0x7] ss:$0 sm:$0xff] }
  0x66   :  { %v509_v39 = vadd.f32 %v508_v62, %v506_v57  ;;  %v548_v9 = vmin.f32 %v526_v45, %v544_v8  ;;  %v549_v11 = vmin.f32 %v527_v46, %v545_v10  ;;  %v561_v60 = vmul.f32 %v764_v54, %v984_v5  ;;  %v768_v8 = vld [vmem:[#allocation9 + $0x7] ss:$0 sm:$0xff] }
  0x67   :  { %v448_v20 = vadd.f32 %v447_v12, %v446_v56  ;;  %v550_v21 = vadd.f32 %v546_v27, %v528_v59  ;;  %v551_v14 = vadd.f32 %v547_v13, %v529_v50  ;;  %v562_v23 = vmul.f32 %v764_v54, %v986_v6 }
  0x68   :  { %v510_v61 = vadd.f32 %v509_v39, %v507_v58  ;;  %v552_v25 = vadd.f32 %v548_v9, %v530_v52  ;;  %v553_v24 = vadd.f32 %v549_v11, %v531_v63  ;;  %v563_v26 = vmul.f32 %v764_v54, %v988_v7 }
  0x69   :  { %450 = vst [vmem:[#allocation13 + $0x4] sm:$0x1] %v448_v20  ;;  %v555_v29 = vadd.f32 %v763_v15, %v550_v21  ;;  %v556_v38 = vadd.f32 %v763_v15, %v551_v14  ;;  %v588_v19 = vadd.f32 %v765_v18, %v524_v30  ;;  %v589_v32 = vadd.f32 %v765_v18, %v525_v31 }
  0x6a   :  { %v511_v53 = vrot.slane %v510_v61, 4  ;;  %v557_v37 = vadd.f32 %v763_v15, %v552_v25  ;;  %v558_v40 = vadd.f32 %v763_v15, %v553_v24  ;;  %v590_v41 = vadd.f32 %v765_v18, %v526_v45 }
  0x6b   :  { %v564_v16 = vsub.f32 %v555_v29, %v560_v28  ;;  %v565_v17 = vsub.f32 %v556_v38, %v561_v60  ;;  %v591_v47 = vadd.f32 %v765_v18, %v527_v46  ;;  %v592_v50 = vsub.f32 %v588_v19, %v546_v27  ;;  %v767_v60 = vld [vmem:[#allocation7 + $0x7] ss:$0 sm:$0xff] }
  0x6c   :  { %v512_v48 = vadd.f32 %v511_v53, %v510_v61  ;;  %v566_v55 = vsub.f32 %v557_v37, %v562_v23  ;;  %v567_v59 = vsub.f32 %v558_v40, %v563_v26  ;;  %v593_v54 = vsub.f32 %v589_v32, %v547_v13 }
  0x6d   :  { %v568_v51 = vmax.f32 %v564_v16, 0.0  ;;  %v569_v56 = vmax.f32 %v565_v17, 0.0  ;;  %v594_v57 = vsub.f32 %v590_v41, %v548_v9  ;;  %v610_v31 = vmul.f32 %v766_v22, %v974_v0 }
  0x6e   :  { %v513_v58 = vrot.slane %v512_v48, 2  ;;  %v570_v52 = vmax.f32 %v566_v55, 0.0  ;;  %v571_v30 = vmax.f32 %v567_v59, 0.0  ;;  %v595_v63 = vsub.f32 %v591_v47, %v549_v11 }
  0x6f   :  { %v572_v62 = vmul.f32 %v568_v51, %v1002_v33  ;;  %v573_v45 = vmul.f32 %v569_v56, %v1004_v34  ;;  %v596_v46 = vmul.f32 %v568_v51, %v1010_v42  ;;  %v597_v13 = vmul.f32 %v569_v56, %v1012_v43 }
  0x70   :  { %v514_v10 = vadd.f32 %v513_v58, %v512_v48  ;;  %v574_v12 = vmul.f32 %v570_v52, %v1006_v35  ;;  %v575_v27 = vmul.f32 %v571_v30, %v1008_v36  ;;  %v598_v28 = vmul.f32 %v570_v52, %v1014_v44 }
  0x71   :  { %v576_v15 = vadd.f32 %v573_v45, %v572_v62  ;;  %v611_v0 = vmul.f32 %v766_v22, %v976_v1  ;;  %v612_v18 = vmul.f32 %v766_v22, %v978_v2  ;;  %v599_v9 = vmul.f32 %v571_v30, %v1016_v49 }
  0x72   :  { %v515_v39 = vrot.slane %v514_v10, 1  ;;  %v613_v42 = vmul.f32 %v766_v22, %v980_v3  ;;  %v614_v11 = vmin.f32 %v592_v50, %v610_v31  ;;  %v628_v23 = vmul.f32 %v768_v8, %v982_v4 }
  0x73   :  { %v577_v20 = vadd.f32 %v576_v15, %v574_v12  ;;  %v615_v21 = vmin.f32 %v593_v54, %v611_v0  ;;  %v616_v14 = vmin.f32 %v594_v57, %v612_v18  ;;  %v629_v44 = vmul.f32 %v768_v8, %v984_v5 }
  0x74   :  { %v516_v43 = vadd.f32 %v515_v39, %v514_v10  ;;  %v617_v61 = vmin.f32 %v595_v63, %v613_v42  ;;  %v618_v25 = vadd.f32 %v614_v11, %v596_v46  ;;  %v630_v26 = vmul.f32 %v768_v8, %v986_v6 }
  0x75   :  { %v578_v1 = vadd.f32 %v577_v20, %v575_v27  ;;  %v619_v24 = vadd.f32 %v615_v21, %v597_v13  ;;  %v620_v2 = vadd.f32 %v616_v14, %v598_v28  ;;  %v631_v29 = vmul.f32 %v768_v8, %v988_v7 }
  0x76   :  { %518 = vst [vmem:[#allocation13 + $0x5] sm:$0x1] %v516_v43  ;;  %v621_v49 = vadd.f32 %v617_v61, %v599_v9  ;;  %v623_v3 = vadd.f32 %v767_v60, %v618_v25 }
  0x77   :  { %v579_v38 = vrot.slane %v578_v1, 4  ;;  %v624_v19 = vadd.f32 %v767_v60, %v619_v24  ;;  %v625_v32 = vadd.f32 %v767_v60, %v620_v2 }
  0x78   :  { %v626_v53 = vadd.f32 %v767_v60, %v621_v49  ;;  %v632_v4 = vsub.f32 %v623_v3, %v628_v23 }
  0x79   :  { %v580_v37 = vadd.f32 %v579_v38, %v578_v1  ;;  %v633_v40 = vsub.f32 %v624_v19, %v629_v44  ;;  %v634_v41 = vsub.f32 %v625_v32, %v630_v26 }
  0x7a   :  { %v635_v22 = vsub.f32 %v626_v53, %v631_v29  ;;  %v636_v5 = vmax.f32 %v632_v4, 0.0 }
  0x7b   :  { %v581_v16 = vrot.slane %v580_v37, 2  ;;  %v637_v17 = vmax.f32 %v633_v40, 0.0  ;;  %v638_v47 = vmax.f32 %v634_v41, 0.0 }
  0x7c   :  { %v639_v48 = vmax.f32 %v635_v22, 0.0  ;;  %v640_v6 = vmul.f32 %v636_v5, %v1002_v33 }
  0x7d   :  { %v582_v55 = vadd.f32 %v581_v16, %v580_v37  ;;  %v641_v59 = vmul.f32 %v637_v17, %v1004_v34  ;;  %v642_v7 = vmul.f32 %v638_v47, %v1006_v35 }
  0x7e   :  { %v643_v51 = vmul.f32 %v639_v48, %v1008_v36 }
  0x7f   :  { %v583_v50 = vrot.slane %v582_v55, 1  ;;  %v644_v56 = vadd.f32 %v641_v59, %v640_v6 }
  0x81   :  { %v584_v54 = vadd.f32 %v583_v50, %v582_v55  ;;  %v645_v57 = vadd.f32 %v644_v56, %v642_v7 }
  0x83   :  { %586 = vst [vmem:[#allocation13 + $0x6] sm:$0x1] %v584_v54  ;;  %v646_v58 = vadd.f32 %v645_v57, %v643_v51 }
  0x85   :  { %v647_v52 = vrot.slane %v646_v58, 4 }
  0x87   :  { %v648_v30 = vadd.f32 %v647_v52, %v646_v58 }
  0x89   :  { %v649_v31 = vrot.slane %v648_v30, 2 }
  0x8b   :  { %v650_v62 = vadd.f32 %v649_v31, %v648_v30 }
  0x8d   :  { %v651_v33 = vrot.slane %v650_v62, 1 }
  0x8f   :  { %v652_v34 = vadd.f32 %v651_v33, %v650_v62 }
  0x91   :  { %654 = vst [vmem:[#allocation13 + $0x7] sm:$0x1] %v652_v34 }
  0x92   :  { %686 = dma.vmem_to_hbm [thread:$0]  %s682_s4, 128, %s684_s19, [#allocation6]  }
  0x93   :  { %919 = dma.done.wait [#allocation6], 128  }
  0x94   :  { %920 = vsyncadd [#allocation6], 4294967168 }
  0x95   :  { %691 = vsyncpa [#allocation5], 1 }
  0x96   :  { %692 = vsyncpa [#allocation8], 1 }
  0x97   :  { %693 = vsyncpa [#allocation11], 1 }
  0x98   :  { %694 = vsyncpa [#allocation6], 1 }

</bundles_post_ra>
